<compile_context>
chip_gen: v6e
topology: v6e:2x2x1
jax: 0.10.0
libtpu: 0.0.40
codegen_flags: <defaults>
</compile_context>

<pallas_src>
import math

import jax
import jax.numpy as jnp
from jax.experimental import pallas as pl
from jax.experimental.pallas import tpu as pltpu


def cancelout_kernel(x_ref, w_ref, o_ref):
    # w_ref: (1, tile_f) f32 ; x_ref / o_ref: (tile_b, tile_f)
    gate = jax.nn.sigmoid(w_ref[...])  # f32 gate == torch.sigmoid(w.float())
    x = x_ref[...]
    if x.dtype == jnp.float32:
        o_ref[...] = (x * gate).astype(o_ref.dtype)
    else:
        # Narrow-dtype path: multiply in native dtype (bf16 VALU on v6e/v7x);
        # on v5e the implicit pack/unpack is free filler under the DMA.
        o_ref[...] = (x * gate.astype(x.dtype)).astype(o_ref.dtype)


def _default_block_bytes():
    """Per-generation x-block byte budget."""
    kind = ""
    try:
        kind = jax.devices()[0].device_kind.lower()
    except Exception:
        pass
    if "v5" in kind:
        # v5e scoped-VMEM default is only 16 MiB: 2 MiB blocks (8 MiB of
        # x+out double-buffers) already reach >=85% of its HBM roofline.
        return 2 * 1024 * 1024
    if "v6" in kind or "v7" in kind:
        # 4 MiB blocks -> ~16 MiB of double-buffers: under the 32 MiB scoped
        # default and v7x's 64 MiB physical VMEM.  Cuts per-step overhead,
        # which matters most on v7x's ~3.2 TB/s HBM.
        return 4 * 1024 * 1024
    return 2 * 1024 * 1024


def _choose_tiles(B, F, dtype, target_block_bytes):
    """Pick (tile_b, tile_f) for the x/out blocks."""
    itemsize = jnp.dtype(dtype).itemsize
    sub = max(8, 32 // itemsize)   # sublane packing: 8 (f32), 16 (bf16), 32 (int8)
    lane = 128
    total_bytes = B * F * itemsize
    tiny = min(256 * 1024, target_block_bytes)

    # Tiny problems: one block -- grid / pipeline overhead would dominate.
    if total_bytes <= tiny or B <= sub:
        return B, F

    # Feature axis: keep full-F rows (contiguous DMAs, 1-D grid) unless even
    # `sub` rows of F can't fit the block budget (F is then enormous).
    if F * itemsize * sub > target_block_bytes and F > 2 * lane:
        tile_f = (target_block_bytes // (sub * itemsize)) // lane * lane
        tile_f = max(lane, min(tile_f, (F // lane) * lane))
    else:
        tile_f = F

    # Batch axis: as many rows as the budget allows, but force >= ~4 grid
    # steps so the pipeline overlaps DMA with compute and megacore can shard.
    rows_budget = max(sub, (target_block_bytes // (tile_f * itemsize)) // sub * sub)
    rows_steps = max(sub, (B // 4) // sub * sub)
    tile_b = min(rows_budget, rows_steps)

    # Prefer an even number of batch steps (balanced split across v7x's 2 TCs).
    steps = pl.cdiv(B, tile_b)
    if steps % 2 == 1 and steps >= 3:
        cand = ((pl.cdiv(B, steps + 1) + sub - 1) // sub) * sub
        if cand >= sub and pl.cdiv(B, cand) % 2 == 0:
            tile_b = cand

    return tile_b, tile_f


def cancelout(x, weights, *, target_block_bytes=None):
    """x: (B, F), weights: (F,) -> (B, F) = x * sigmoid(weights.astype(f32))."""
    B, F = x.shape
    assert weights.shape == (F,)
    if target_block_bytes is None:
        target_block_bytes = _default_block_bytes()

    gate_w = weights.astype(jnp.float32)
    lane = 128

    # Lane-dense packing for narrow / misaligned feature counts: fold r rows
    # into one so the packed width r*F is a multiple of 128 lanes.
    r = 1
    if F % lane != 0:
        r = lane // math.gcd(F, lane)
        if r > B or B % r != 0:
            r = 1  # can't fold evenly; fall back to (possibly masked) stores
    if r > 1:
        xp = x.reshape(B // r, r * F)              # contiguous, free
        wp = jnp.tile(gate_w, r).reshape(1, r * F)
    else:
        xp = x
        wp = gate_w.reshape(1, F)
    Bp, Fp = xp.shape

    tile_b, tile_f = _choose_tiles(Bp, Fp, x.dtype, target_block_bytes)

    if tile_f == Fp:
        # Common case: 1-D grid over batch, full-row contiguous slabs.
        grid = (pl.cdiv(Bp, tile_b),)
        in_specs = [
            pl.BlockSpec((tile_b, Fp), lambda i: (i, 0)),   # x slab
            pl.BlockSpec((1, Fp), lambda i: (0, 0)),        # gate row (resident)
        ]
        out_specs = pl.BlockSpec((tile_b, Fp), lambda i: (i, 0))
        dims = ("parallel",)
    else:
        # Extremely wide F only: feature-outer / batch-inner so the gate block
        # index is constant across the inner loop (no per-step gate re-DMA).
        grid = (pl.cdiv(Fp, tile_f), pl.cdiv(Bp, tile_b))
        in_specs = [
            pl.BlockSpec((tile_b, tile_f), lambda j, i: (i, j)),
            pl.BlockSpec((1, tile_f), lambda j, i: (0, j)),
        ]
        out_specs = pl.BlockSpec((tile_b, tile_f), lambda j, i: (i, j))
        dims = ("parallel", "parallel")

    # Explicit scoped-VMEM limit only when we use bigger-than-default blocks.
    vmem_limit = 32 * 1024 * 1024 if target_block_bytes > 2 * 1024 * 1024 else None

    out = pl.pallas_call(
        cancelout_kernel,
        out_shape=jax.ShapeDtypeStruct((Bp, Fp), x.dtype),
        grid_spec=pltpu.PrefetchScalarGridSpec(
            num_scalar_prefetch=0,
            grid=grid,
            in_specs=in_specs,
            out_specs=out_specs,
        ),
        compiler_params=pltpu.CompilerParams(
            dimension_semantics=dims,
            vmem_limit_bytes=vmem_limit,
        ),
    )(xp, wp)

    return out.reshape(B, F) if r > 1 else out


if __name__ == "__main__":
    key = jax.random.PRNGKey(0)

    # --- typical CancelOut use: narrow feature-selection layer (F % 128 != 0,
    #     exercises the lane-dense packing path). Module init: weights = zeros.
    B, F = 32, 20
    x = jax.random.normal(key, (B, F), dtype=jnp.float32)
    weights = jnp.zeros((F,), dtype=jnp.float32)
    out = jax.block_until_ready(cancelout(x, weights))
    ref = x * jax.nn.sigmoid(weights.astype(jnp.float32))
    assert out.shape == (B, F) and out.dtype == x.dtype
    assert jnp.allclose(out, ref, atol=1e-6, rtol=1e-6)

    # --- non-foldable narrow case (B % r != 0): fallback path, still correct.
    xs = jax.random.normal(key, (7, 20), dtype=jnp.float32)
    ws = jax.random.normal(key, (20,), dtype=jnp.float32)
    outs = jax.block_until_ready(cancelout(xs, ws))
    assert jnp.allclose(outs, xs * jax.nn.sigmoid(ws), atol=1e-6, rtol=1e-6)

    # --- tiled path: force a multi-step 1-D grid with a small block budget.
    k1, k2 = jax.random.split(key)
    B2, F2 = 512, 256
    x2 = jax.random.normal(k1, (B2, F2), dtype=jnp.float32)
    w2 = jax.random.normal(k2, (F2,), dtype=jnp.float32)
    out2 = jax.block_until_ready(cancelout(x2, w2, target_block_bytes=64 * 1024))
    ref2 = x2 * jax.nn.sigmoid(w2.astype(jnp.float32))
    assert jnp.allclose(out2, ref2, atol=1e-6, rtol=1e-6)

    # --- bf16 path (native-dtype multiply on v6e/v7x), also tiled.
    x3 = x2.astype(jnp.bfloat16)
    out3 = jax.block_until_ready(cancelout(x3, w2, target_block_bytes=64 * 1024))
    ref3 = (x3 * jax.nn.sigmoid(w2.astype(jnp.float32)).astype(jnp.bfloat16))
    assert out3.dtype == jnp.bfloat16
    assert jnp.allclose(out3.astype(jnp.float32), ref3.astype(jnp.float32),
                        atol=1e-2, rtol=1e-2)

    print("KERNEL_OK")
</pallas_src>

<mosaic_0001>
module attributes {stable_mosaic.version = 11 : i64} {
  func.func @cancelout_kernel(%arg0: i32, %arg1: memref<1x640xf32, #tpu.memory_space<vmem>>, %arg2: memref<1x640xf32, #tpu.memory_space<vmem>>, %arg3: memref<1x640xf32, #tpu.memory_space<vmem>>) attributes {dimension_semantics = [#tpu.dimension_semantics<parallel>], iteration_bounds = array<i64: 1>, scalar_prefetch = 0 : i64, scratch_operands = 0 : i64, tpu.core_type = #tpu.core_type<tc>, window_params = [{transform_indices = @transform_0, window_bounds = array<i64: 1, 640>}, {pipeline_mode = #tpu.pipeline_mode<synchronous>, transform_indices = @transform_1, window_bounds = array<i64: 1, 640>}, {transform_indices = @transform_2, window_bounds = array<i64: 1, 640>}]} {
    %c0 = arith.constant 0 : index
    %c0_0 = arith.constant 0 : index
    %0 = vector.load %arg2[%c0, %c0_0] : memref<1x640xf32, #tpu.memory_space<vmem>>, vector<1x640xf32>
    %1 = arith.negf %0 : vector<1x640xf32>
    %2 = math.exp %1 : vector<1x640xf32>
    %cst = arith.constant 1.000000e+00 : f32
    %3 = vector.broadcast %cst : f32 to vector<1x640xf32>
    %4 = arith.addf %3, %2 : vector<1x640xf32>
    %5 = arith.divf %3, %4 : vector<1x640xf32>
    %c0_1 = arith.constant 0 : index
    %c0_2 = arith.constant 0 : index
    %6 = vector.load %arg1[%c0_1, %c0_2] : memref<1x640xf32, #tpu.memory_space<vmem>>, vector<1x640xf32>
    %7 = arith.mulf %6, %5 : vector<1x640xf32>
    %c0_3 = arith.constant 0 : index
    %c0_4 = arith.constant 0 : index
    %8 = vector.load %arg3[%c0_3, %c0_4] : memref<1x640xf32, #tpu.memory_space<vmem>>, vector<1x640xf32>
    tpu.vector_store %arg3[%c0_3, %c0_4], %7 {strides = array<i32>} : memref<1x640xf32, #tpu.memory_space<vmem>>, vector<1x640xf32>,
    return
  }
  func.func @transform_0(%arg0: i32) -> (i32, i32) {
    %c0_i32 = arith.constant 0 : i32
    %c0_i32_0 = arith.constant 0 : i32
    return %arg0, %c0_i32 : i32, i32
  }
  func.func @transform_1(%arg0: i32) -> (i32, i32) {
    %c0_i32 = arith.constant 0 : i32
    %c0_i32_0 = arith.constant 0 : i32
    %c0_i32_1 = arith.constant 0 : i32
    return %c0_i32, %c0_i32_0 : i32, i32
  }
  func.func @transform_2(%arg0: i32) -> (i32, i32) {
    %c0_i32 = arith.constant 0 : i32
    %c0_i32_0 = arith.constant 0 : i32
    return %arg0, %c0_i32 : i32, i32
  }
}

</mosaic_0001>

<bundles_post_ra>
// kernel: tpu_custom_call.1
= control target key start
LH: loop header
LB: loop body
LE: loop exit
PB: predicated region body
PF: predicated region fallthrough
CT: control target
= control target key end

     0   :  { %7 = vsyncpa [#allocation3], 0  ;;  %s167_s0 = inlined_call_operand.hbm [shape: f32[1,640], index: 0, kind: input, shape index: {}]   ;;  %s168_s1 = inlined_call_operand.hbm [shape: f32[1,640], index: 1, kind: input, shape index: {}]   ;;  %s169_s2 = inlined_call_operand.hbm [shape: f32[1,640], index: 2, kind: output, shape index: {}]  }
   0x1   :  { %8 = vsyncpa [#allocation6], 0 }
   0x2   :  { %9 = vsyncpa [#allocation4], 0  ;;  %s140_s9 = smov [#allocation2]   ;;  %s141_s11 = smov [#allocation5]  }
   0x3   :  { %s16_s10 = sshll.u32 %s140_s9, 4  ;;  %s26_s12 = sshll.u32 %s141_s11, 4  ;;  %s17_s10 = int_to_ptr.vmem [resolvable:$true] %s16_s10  ;;  %s27_s12 = int_to_ptr.vmem [resolvable:$true] %s26_s12 }
   0x4   :  { %s82_s13 = scalar_lea.vmem %s17_s10, 80  ;;  %s86_s14 = scalar_lea.vmem %s17_s10, 96 }
   0x5   :  { %p83_p0 = scmp.ne.s32.totalorder %s17_s10, %s82_s13  ;;  %p87_p1 = scmp.lt.s32.totalorder %s17_s10, %s17_s10 }
   0x6   :  { %p88_p2 = scmp.lt.s32.totalorder %s86_s14, %s82_s13 }
   0x8   :  { %p89_p3 = por %p88_p2, %p87_p1 }
   0xa   :  { %p90_p4 = pnand %p89_p3, %p83_p0 }
   0xc   :  { %93 = shalt.err (!%p90_p4)
}
   0xd   :  { %19 = dma.hbm_to_vmem [thread:$0]  %s167_s0, 80, %s17_s10, [#allocation3]  }
   0xe   :  { %s102_s17 = scalar_lea.vmem %s27_s12, 80  ;;  %s106_s18 = scalar_lea.vmem %s27_s12, 96 }
   0xf   :  { %p103_p5 = scmp.ne.s32.totalorder %s27_s12, %s102_s17  ;;  %p107_p6 = scmp.lt.s32.totalorder %s27_s12, %s27_s12 }
  0x10   :  { %p108_p7 = scmp.lt.s32.totalorder %s106_s18, %s102_s17 }
  0x12   :  { %p109_p8 = por %p108_p7, %p107_p6 }
  0x14   :  { %p110_p9 = pnand %p109_p8, %p103_p5 }
  0x16   :  { %113 = shalt.err (!%p110_p9)
}
  0x17   :  { %29 = dma.hbm_to_vmem [thread:$0]  %s168_s1, 80, %s27_s12, [#allocation6]  }
  0x18   :  { %134 = dma.done.wait [#allocation3], 80  }
  0x19   :  { %135 = vsyncadd [#allocation3], 4294967216 }
  0x1a   :  { %136 = dma.done.wait [#allocation6], 80  }
  0x1b   :  { %137 = vsyncadd [#allocation6], 4294967216  ;;  %v36_v0 = vld [vmem:[#allocation5] sm:$0x1f]  ;;  %v45_v4 = vlaneseq  ;;  %v43_v5 = vld [vmem:[#allocation2] sm:$0x1f] }
  0x1c   :  { %v66_v1 = vmul.f32 -1.442695, %v36_v0  ;;  %s142_s0 = smov [#allocation7]  }
  0x1d   :  { %s56_s21 = sshll.u32 %s142_s0, 4  ;;  %vm47_vm0 = vcmp.lt.s32.totalorder %v45_v4, 640  ;;  %s57_s21 = int_to_ptr.vmem [resolvable:$true] %s56_s21 }
  0x1e   :  { %70 = vpow2.f32 %v66_v1  ;;  %s114_s1 = scalar_lea.vmem %s57_s21, 80  ;;  %s118_s22 = scalar_lea.vmem %s57_s21, 96 }
  0x1f   :  { %p115_p10 = scmp.ne.s32.totalorder %s57_s21, %s114_s1  ;;  %p119_p11 = scmp.lt.s32.totalorder %s57_s21, %s57_s21 }
  0x20   :  { %p120_p12 = scmp.lt.s32.totalorder %s118_s22, %s114_s1 }
  0x22   :  { %p121_p13 = por %p120_p12, %p119_p11 }
  0x24   :  { %p122_p0 = pnand %p121_p13, %p115_p10 }
  0x2b   :  { %v71_v2 = vpop.eup %70 }
  0x2c   :  { %v40_v3 = vadd.f32 1.0, %v71_v2 }
  0x2e   :  { %72 = vrcp.f32 %v40_v3 }
  0x3b   :  { %v73_v6 = vpop.eup %72 }
  0x3c   :  { %v44_v7 = vmul.f32 %v73_v6, %v43_v5 }
  0x3e   :  { %49 = vst.msk [vmem:[#allocation7] sm:$0x1f] %vm47_vm0, %v44_v7 }
  0x3f   :  { %125 = shalt.err (!%p122_p0)
}
  0x40   :  { %59 = dma.vmem_to_hbm [thread:$0]  %s57_s21, 80, %s169_s2, [#allocation4]  }
  0x41   :  { %138 = dma.done.wait [#allocation4], 80  }
  0x42   :  { %139 = vsyncadd [#allocation4], 4294967216 }
  0x43   :  { %63 = vsyncpa [#allocation3], 1 }
  0x44   :  { %64 = vsyncpa [#allocation6], 1 }
  0x45   :  { %65 = vsyncpa [#allocation4], 1 }

</bundles_post_ra>
